<compile_context>
chip_gen: v7x
topology: tpu7x:2x2x1
jax: 0.10.0
libtpu: 0.0.40
codegen_flags: <defaults>
</compile_context>

<pallas_src>
import functools
import math

import jax
import jax.numpy as jnp
import numpy as np
from jax.experimental import pallas as pl
from jax.experimental.pallas import tpu as pltpu


def _cdiv(a, b):
    return -(-a // b)


def _scale_loss_kernel(ex_ref, pred_ref, target_ref, out_ref,
                       dprev_ref, mprev_ref, *,
                       min_dist, max_dist, width, plane_elems, n_planes,
                       multi_tile):
    """Reduce one (planes x lanes) block to 4 partial sums.

    Output block (1, 8, 128): sublane 0, lanes 0..3 =
      [sum(m*d^2), sum(m*d), count(m), sum(m*nan_to_num(grad))], rest zeros.
    """
    i = pl.program_id(0)          # plane-block index ("parallel")
    j = pl.program_id(1)          # L-tile index      ("arbitrary", innermost)
    tb, tl = pred_ref.shape

    p = pred_ref[...].astype(jnp.float32)
    t = target_ref[...].astype(jnp.float32)
    d = p - t

    # ---- validity / border masks (iota + scalar compares only) ----
    lane = jax.lax.broadcasted_iota(jnp.int32, (1, tl), 1)
    gidx = lane + j * tl                          # flat index within the plane
    in_plane = gidx < plane_elems                 # ragged final L-tile
    has_down = gidx < (plane_elems - width)       # pixel row < H-1
    has_right = ex_ref[...] > 0.5                 # pixel col < W-1 (precomputed)

    sub_idx = jax.lax.broadcasted_iota(jnp.int32, (tb, 1), 0)
    plane_ok = (i * tb + sub_idx) < n_planes      # ragged final plane block

    m = jnp.logical_and(t > min_dist, t < max_dist)
    m = jnp.logical_and(m, plane_ok)
    m = jnp.logical_and(m, in_plane)

    dm = jnp.where(m, d, 0.0)                     # select: garbage/NaN safe

    # ---- forward-difference gradient magnitude (XLU rolls) ----
    right = pltpu.roll(d, shift=tl - 1, axis=1)       # d[k+1]   (wrap masked)
    down = pltpu.roll(d, shift=tl - width, axis=1)    # d[k+W]   (wrap masked)
    internal_down = jnp.logical_and(has_down, lane < (tl - width))
    g = (jnp.where(has_right, jnp.abs(right - d), 0.0)
         + jnp.where(internal_down, jnp.abs(down - d), 0.0))
    # torch.nan_to_num(nan=0, posinf=0, neginf=0) fused with the dist mask.
    gm = jnp.where(jnp.logical_and(m, jnp.isfinite(g)), g, 0.0)

    s_sq = jnp.sum(dm * dm)
    s_d = jnp.sum(dm)
    s_c = jnp.sum(m.astype(jnp.float32))
    s_g = jnp.sum(gm)

    if multi_tile:
        # dy for the LAST pixel row of the previous L-tile: its lower neighbour
        # is this tile's first row, which already sits at lanes >= tl-width of
        # `down`.  The previous tile's d / mask were carried in VMEM scratch.
        bsel = jnp.logical_and(lane >= (tl - width), j > 0)
        dy_b = down - dprev_ref[...]
        bsel = jnp.logical_and(bsel, mprev_ref[...] > 0.5)
        bsel = jnp.logical_and(bsel, jnp.isfinite(dy_b))
        s_g = s_g + jnp.sum(jnp.where(bsel, jnp.abs(dy_b), 0.0))

        @pl.when(j + 1 < pl.num_programs(1))
        def _():
            dprev_ref[...] = d
            mprev_ref[...] = jnp.where(m, 1.0, 0.0)

    # ---- partial sums into a full (8,128) tile (unmasked stores) ----
    lane8 = jax.lax.broadcasted_iota(jnp.int32, (1, 8, 128), 2)
    sub8 = jax.lax.broadcasted_iota(jnp.int32, (1, 8, 128), 1)
    vals = jnp.where(lane8 == 0, s_sq, 0.0)
    vals = jnp.where(lane8 == 1, s_d, vals)
    vals = jnp.where(lane8 == 2, s_c, vals)
    vals = jnp.where(lane8 == 3, s_g, vals)
    out_ref[...] = jnp.where(sub8 == 0, vals, 0.0)


def scale_loss(pred, target, *, min_dist, max_dist, max_block_elems=None):
    """Pallas implementation of ScaleLoss.forward. Returns dict with 'loss'."""
    B, C, H, W = pred.shape
    n = B * C
    L = H * W
    p = pred.reshape(n, L)          # copy-free; native dtype streams into VMEM
    t = target.reshape(n, L)
    itemsize = p.dtype.itemsize
    sub = max(8, 32 // itemsize)    # sublane packing: 8 f32 / 16 bf16 / 32 int8

    # Generation-aware sizing (v5e/v6e: 128 MiB VMEM, v7x: 64 MiB per TC).
    vmem_cap = 64 << 20
    try:
        vmem_cap = int(pltpu.get_tpu_info().vmem_capacity_bytes)
    except Exception:
        pass
    big_vmem = vmem_cap >= (100 << 20)
    if max_block_elems is None:
        max_block_elems = (2 << 20) if big_vmem else (1 << 20)  # elements/block
    vmem_soft_cap = (96 << 20) if big_vmem else (48 << 20)

    # --- L-axis tiling: whole image rows per tile, lane width multiple of 128.
    rpt_unit = 128 // math.gcd(W, 128)            # min rows so rpt*W % 128 == 0
    rows_budget = max(1, max_block_elems // max(1, sub * W))
    if rows_budget >= H or rpt_unit >= H:
        rpt, TL = H, L                            # whole plane per tile
    else:
        rpt = max(rpt_unit, (rows_budget // rpt_unit) * rpt_unit)
        TL = rpt * W
    num_j = _cdiv(H, rpt)
    multi_tile = num_j > 1

    # --- plane-axis tiling (ragged tail masked in-kernel; no padding copy).
    tb = max(sub, ((max_block_elems // TL) // sub) * sub)
    if tb >= n:
        tb = n
    num_i = _cdiv(n, tb)
    if num_i == 1 and n > sub:                    # >= 2 steps for v7x megacore
        tb_half = sub * _cdiv(_cdiv(n, 2), sub)
        if 0 < tb_half < n:
            tb = tb_half
            num_i = _cdiv(n, tb)

    # Column border mask (col < W-1). Tiles are row-aligned, so one (1, TL) row
    # serves every tile; its block index is constant -> fetched once.
    col = np.arange(TL, dtype=np.int64) % W
    ex = jnp.asarray((col < (W - 1)).astype(np.float32)[None, :])

    # VMEM: double-buffered inputs + f32 elementwise temporaries + carry scratch.
    blk_in = tb * TL * itemsize
    blk_f32 = tb * TL * 4
    needed = (4 * blk_in + 6 * blk_f32
              + (2 * blk_f32 if multi_tile else 0) + (6 << 20))
    vmem_limit = int(min(max(needed, 32 << 20), vmem_soft_cap))
    vmem_limit = max(vmem_limit, int(needed))     # never under-provision

    if multi_tile:
        carry = [pltpu.VMEM((tb, TL), jnp.float32),
                 pltpu.VMEM((tb, TL), jnp.float32)]
    else:  # carry unused; tiny placeholders
        carry = [pltpu.VMEM((8, 128), jnp.float32),
                 pltpu.VMEM((8, 128), jnp.float32)]

    num_steps = num_i * num_j
    partials = pl.pallas_call(
        functools.partial(_scale_loss_kernel,
                          min_dist=float(min_dist), max_dist=float(max_dist),
                          width=W, plane_elems=L, n_planes=n,
                          multi_tile=multi_tile),
        out_shape=jax.ShapeDtypeStruct((num_steps, 8, 128), jnp.float32),
        grid_spec=pltpu.PrefetchScalarGridSpec(
            num_scalar_prefetch=0,
            grid=(num_i, num_j),
            in_specs=[
                pl.BlockSpec((1, TL), lambda i, j: (0, 0)),    # column mask
                pl.BlockSpec((tb, TL), lambda i, j: (i, j)),   # pred planes
                pl.BlockSpec((tb, TL), lambda i, j: (i, j)),   # target planes
            ],
            out_specs=pl.BlockSpec((1, 8, 128),
                                   lambda i, j: (i * num_j + j, 0, 0)),
            scratch_shapes=carry,
        ),
        compiler_params=pltpu.CompilerParams(
            dimension_semantics=("parallel", "arbitrary"),
            vmem_limit_bytes=vmem_limit),
    )(ex, p, t)

    sums = jnp.sum(partials, axis=(0, 1))
    s_sq, s_d, cnt, s_g = sums[0], sums[1], sums[2], sums[3]
    mse = s_sq / cnt
    scale = (s_d ** 2) / (2.0 * cnt ** 2)
    grad_mean = s_g / cnt
    loss = mse - scale + grad_mean
    print(f"[loss_components] mse: {mse}, scale: {scale}, grad: {grad_mean}")
    return {'loss': loss, 'mse': mse, 'scale': scale, 'grad': grad_mean}


def _reference(pred, target, *, min_dist, max_dist):
    """Pure-JAX reference mirroring the PyTorch forward."""
    d = pred - target
    mask = (target > min_dist) & (target < max_dist)
    mf = mask.astype(jnp.float32)
    cnt = jnp.sum(mf)
    mse = jnp.sum(d * d * mf) / cnt
    scale = jnp.sum(d * mf) ** 2 / (2.0 * cnt ** 2)
    dx = jnp.zeros_like(d).at[..., :-1].set(d[..., 1:] - d[..., :-1])
    dy = jnp.zeros_like(d).at[..., :-1, :].set(d[..., 1:, :] - d[..., :-1, :])
    g = jnp.abs(dx) + jnp.abs(dy)
    g = jnp.where(jnp.isfinite(g), g, 0.0)
    grad = jnp.sum(g * mf) / cnt
    return mse - scale + grad


if __name__ == "__main__":
    def check(name, prd, tgt, min_dist=0.1, max_dist=10.0, **kw):
        out = scale_loss(prd, tgt, min_dist=min_dist, max_dist=max_dist, **kw)
        loss = jax.block_until_ready(out['loss'])
        ref = jax.block_until_ready(
            _reference(prd.astype(jnp.float32), tgt.astype(jnp.float32),
                       min_dist=min_dist, max_dist=max_dist))
        np.testing.assert_allclose(np.asarray(loss), np.asarray(ref),
                                   rtol=1e-4, atol=1e-5)
        print(f"[{name}] loss={float(loss):.6f}  ref={float(ref):.6f}")

    key = jax.random.PRNGKey(0)
    k1, k2, k3, k4 = jax.random.split(key, 4)

    # 1) Module-sized case: f32, one L-tile per plane, single plane block.
    B, C, H, W = 2, 4, 16, 16
    tgt = jax.random.uniform(k1, (B, C, H, W), jnp.float32, 0.0, 12.0)
    prd = tgt + 0.5 * jax.random.normal(k2, (B, C, H, W), jnp.float32)
    check("f32", prd, tgt)

    # 2) bf16 inputs stream in native dtype (half the HBM bytes), f32 math inside.
    check("bf16", prd.astype(jnp.bfloat16), tgt.astype(jnp.bfloat16))

    # 3) Forced tiny block budget: exercises the L-axis tiling, the cross-tile
    #    dy carry, and ragged plane / row tails (no padding copies anywhere).
    B, C, H, W = 3, 4, 20, 24
    tgt = jax.random.uniform(k3, (B, C, H, W), jnp.float32, 0.0, 12.0)
    prd = tgt + 0.5 * jax.random.normal(k4, (B, C, H, W), jnp.float32)
    check("tiled", prd, tgt, max_block_elems=512)

    print("KERNEL_OK")
</pallas_src>

<mosaic_0001>
module attributes {stable_mosaic.version = 11 : i64} {
  func.func @_scale_loss_kernel(%arg0: i32, %arg1: i32, %arg2: memref<1x256xf32, #tpu.memory_space<vmem>>, %arg3: memref<8x256xf32, #tpu.memory_space<vmem>>, %arg4: memref<8x256xf32, #tpu.memory_space<vmem>>, %arg5: memref<1x8x128xf32, #tpu.memory_space<vmem>>, %arg6: memref<8x128xf32, #tpu.memory_space<vmem>>, %arg7: memref<8x128xf32, #tpu.memory_space<vmem>>) attributes {dimension_semantics = [#tpu.dimension_semantics<parallel>, #tpu.dimension_semantics<arbitrary>], iteration_bounds = array<i64: 1, 1>, scalar_prefetch = 0 : i64, scratch_operands = 2 : i64, tpu.core_type = #tpu.core_type<tc>, window_params = [{pipeline_mode = #tpu.pipeline_mode<synchronous>, transform_indices = @transform_0, window_bounds = array<i64: 1, 256>}, {transform_indices = @transform_1, window_bounds = array<i64: 8, 256>}, {transform_indices = @transform_2, window_bounds = array<i64: 8, 256>}, {transform_indices = @transform_3, window_bounds = array<i64: 1, 8, 128>}]} {
    %c0 = arith.constant 0 : index
    %c0_0 = arith.constant 0 : index
    %0 = vector.load %arg3[%c0, %c0_0] : memref<8x256xf32, #tpu.memory_space<vmem>>, vector<8x256xf32>
    %c0_1 = arith.constant 0 : index
    %c0_2 = arith.constant 0 : index
    %1 = vector.load %arg4[%c0_1, %c0_2] : memref<8x256xf32, #tpu.memory_space<vmem>>, vector<8x256xf32>
    %2 = arith.subf %0, %1 : vector<8x256xf32>
    %3 = tpu.iota {dimensions = array<i32: 1>} : vector<1x256xi32>
    %c256_i32 = arith.constant 256 : i32
    %4 = arith.muli %arg1, %c256_i32 : i32
    %5 = vector.broadcast %4 : i32 to vector<1x256xi32>
    %6 = arith.addi %3, %5 : vector<1x256xi32>
    %c256_i32_3 = arith.constant 256 : i32
    %7 = vector.broadcast %c256_i32_3 : i32 to vector<1x256xi32>
    %8 = arith.cmpi slt, %6, %7 : vector<1x256xi32>
    %c240_i32 = arith.constant 240 : i32
    %9 = vector.broadcast %c240_i32 : i32 to vector<1x256xi32>
    %10 = arith.cmpi slt, %6, %9 : vector<1x256xi32>
    %c0_4 = arith.constant 0 : index
    %c0_5 = arith.constant 0 : index
    %11 = vector.load %arg2[%c0_4, %c0_5] : memref<1x256xf32, #tpu.memory_space<vmem>>, vector<1x256xf32>
    %cst = arith.constant 5.000000e-01 : f32
    %12 = vector.broadcast %cst : f32 to vector<1x256xf32>
    %13 = arith.cmpf ogt, %11, %12 : vector<1x256xf32>
    %14 = tpu.iota {dimensions = array<i32: 0>} : vector<8x1xi32>
    %c8_i32 = arith.constant 8 : i32
    %15 = arith.muli %arg0, %c8_i32 : i32
    %16 = vector.broadcast %15 : i32 to vector<8x1xi32>
    %17 = arith.addi %16, %14 : vector<8x1xi32>
    %c8_i32_6 = arith.constant 8 : i32
    %18 = vector.broadcast %c8_i32_6 : i32 to vector<8x1xi32>
    %19 = arith.cmpi slt, %17, %18 : vector<8x1xi32>
    %cst_7 = arith.constant 1.000000e-01 : f32
    %20 = vector.broadcast %cst_7 : f32 to vector<8x256xf32>
    %21 = arith.cmpf ogt, %1, %20 : vector<8x256xf32>
    %cst_8 = arith.constant 1.000000e+01 : f32
    %22 = vector.broadcast %cst_8 : f32 to vector<8x256xf32>
    %23 = arith.cmpf olt, %1, %22 : vector<8x256xf32>
    %24 = arith.andi %21, %23 : vector<8x256xi1>
    %25 = vector.broadcast %19 : vector<8x1xi1> to vector<8x256xi1>
    %26 = arith.andi %24, %25 : vector<8x256xi1>
    %27 = vector.broadcast %8 : vector<1x256xi1> to vector<8x256xi1>
    %28 = arith.andi %26, %27 : vector<8x256xi1>
    %cst_9 = arith.constant 0.000000e+00 : f32
    %29 = vector.broadcast %cst_9 : f32 to vector<8x256xf32>
    %30 = arith.select %28, %2, %29 : vector<8x256xi1>, vector<8x256xf32>
    %c255_i32 = arith.constant 255 : i32
    %31 = tpu.dynamic_rotate %2 by %c255_i32 dim 1 : vector<8x256xf32>, i32 -> vector<8x256xf32>
    %c240_i32_10 = arith.constant 240 : i32
    %32 = tpu.dynamic_rotate %2 by %c240_i32_10 dim 1 : vector<8x256xf32>, i32 -> vector<8x256xf32>
    %c240_i32_11 = arith.constant 240 : i32
    %33 = vector.broadcast %c240_i32_11 : i32 to vector<1x256xi32>
    %34 = arith.cmpi slt, %3, %33 : vector<1x256xi32>
    %35 = arith.andi %10, %34 : vector<1x256xi1>
    %36 = arith.subf %31, %2 : vector<8x256xf32>
    %37 = math.absf %36 : vector<8x256xf32>
    %cst_12 = arith.constant 0.000000e+00 : f32
    %38 = vector.shape_cast %13 : vector<1x256xi1> to vector<1x256xi1>
    %39 = vector.broadcast %38 : vector<1x256xi1> to vector<8x256xi1>
    %40 = vector.broadcast %cst_12 : f32 to vector<8x256xf32>
    %41 = arith.select %39, %37, %40 : vector<8x256xi1>, vector<8x256xf32>
    %42 = arith.subf %32, %2 : vector<8x256xf32>
    %43 = math.absf %42 : vector<8x256xf32>
    %cst_13 = arith.constant 0.000000e+00 : f32
    %44 = vector.shape_cast %35 : vector<1x256xi1> to vector<1x256xi1>
    %45 = vector.broadcast %44 : vector<1x256xi1> to vector<8x256xi1>
    %46 = vector.broadcast %cst_13 : f32 to vector<8x256xf32>
    %47 = arith.select %45, %43, %46 : vector<8x256xi1>, vector<8x256xf32>
    %48 = arith.addf %41, %47 : vector<8x256xf32>
    %49 = tpu.weird %48 : vector<8x256xf32> -> vector<8x256xi1>
    %cst_14 = arith.constant dense<true> : vector<8x256xi1>
    %50 = arith.xori %49, %cst_14 : vector<8x256xi1>
    %51 = arith.andi %28, %50 : vector<8x256xi1>
    %cst_15 = arith.constant 0.000000e+00 : f32
    %52 = vector.broadcast %cst_15 : f32 to vector<8x256xf32>
    %53 = arith.select %51, %48, %52 : vector<8x256xi1>, vector<8x256xf32>
    %54 = arith.mulf %30, %30 : vector<8x256xf32>
    %55 = vector.shape_cast %54 : vector<8x256xf32> to vector<1x8x256xf32>
    %cst_16 = arith.constant dense<0.000000e+00> : vector<1xf32>
    %56 = vector.multi_reduction <add>, %55, %cst_16 [1, 2] : vector<1x8x256xf32> to vector<1xf32>
    %57 = vector.shape_cast %56 : vector<1xf32> to vector<1x1x1xf32>
    %58 = vector.extract %57[0, 0, 0] : f32 from vector<1x1x1xf32>
    %59 = vector.shape_cast %30 : vector<8x256xf32> to vector<1x8x256xf32>
    %cst_17 = arith.constant dense<0.000000e+00> : vector<1xf32>
    %60 = vector.multi_reduction <add>, %59, %cst_17 [1, 2] : vector<1x8x256xf32> to vector<1xf32>
    %61 = vector.shape_cast %60 : vector<1xf32> to vector<1x1x1xf32>
    %62 = vector.extract %61[0, 0, 0] : f32 from vector<1x1x1xf32>
    %63 = arith.extui %28 : vector<8x256xi1> to vector<8x256xi32>
    %64 = arith.sitofp %63 : vector<8x256xi32> to vector<8x256xf32>
    %65 = vector.shape_cast %64 : vector<8x256xf32> to vector<1x8x256xf32>
    %cst_18 = arith.constant dense<0.000000e+00> : vector<1xf32>
    %66 = vector.multi_reduction <add>, %65, %cst_18 [1, 2] : vector<1x8x256xf32> to vector<1xf32>
    %67 = vector.shape_cast %66 : vector<1xf32> to vector<1x1x1xf32>
    %68 = vector.extract %67[0, 0, 0] : f32 from vector<1x1x1xf32>
    %69 = vector.shape_cast %53 : vector<8x256xf32> to vector<1x8x256xf32>
    %cst_19 = arith.constant dense<0.000000e+00> : vector<1xf32>
    %70 = vector.multi_reduction <add>, %69, %cst_19 [1, 2] : vector<1x8x256xf32> to vector<1xf32>
    %71 = vector.shape_cast %70 : vector<1xf32> to vector<1x1x1xf32>
    %72 = vector.extract %71[0, 0, 0] : f32 from vector<1x1x1xf32>
    %73 = tpu.iota {dimensions = array<i32: 2>} : vector<1x8x128xi32>
    %74 = tpu.iota {dimensions = array<i32: 1>} : vector<1x8x128xi32>
    %c0_i32 = arith.constant 0 : i32
    %75 = vector.broadcast %c0_i32 : i32 to vector<1x8x128xi32>
    %76 = arith.cmpi eq, %73, %75 : vector<1x8x128xi32>
    %cst_20 = arith.constant 0.000000e+00 : f32
    %77 = vector.broadcast %58 : f32 to vector<1x8x128xf32>
    %78 = vector.broadcast %cst_20 : f32 to vector<1x8x128xf32>
    %79 = arith.select %76, %77, %78 : vector<1x8x128xi1>, vector<1x8x128xf32>
    %c1_i32 = arith.constant 1 : i32
    %80 = vector.broadcast %c1_i32 : i32 to vector<1x8x128xi32>
    %81 = arith.cmpi eq, %73, %80 : vector<1x8x128xi32>
    %82 = vector.broadcast %62 : f32 to vector<1x8x128xf32>
    %83 = arith.select %81, %82, %79 : vector<1x8x128xi1>, vector<1x8x128xf32>
    %c2_i32 = arith.constant 2 : i32
    %84 = vector.broadcast %c2_i32 : i32 to vector<1x8x128xi32>
    %85 = arith.cmpi eq, %73, %84 : vector<1x8x128xi32>
    %86 = vector.broadcast %68 : f32 to vector<1x8x128xf32>
    %87 = arith.select %85, %86, %83 : vector<1x8x128xi1>, vector<1x8x128xf32>
    %c3_i32 = arith.constant 3 : i32
    %88 = vector.broadcast %c3_i32 : i32 to vector<1x8x128xi32>
    %89 = arith.cmpi eq, %73, %88 : vector<1x8x128xi32>
    %90 = vector.broadcast %72 : f32 to vector<1x8x128xf32>
    %91 = arith.select %89, %90, %87 : vector<1x8x128xi1>, vector<1x8x128xf32>
    %c0_i32_21 = arith.constant 0 : i32
    %92 = vector.broadcast %c0_i32_21 : i32 to vector<1x8x128xi32>
    %93 = arith.cmpi eq, %74, %92 : vector<1x8x128xi32>
    %cst_22 = arith.constant 0.000000e+00 : f32
    %94 = vector.broadcast %cst_22 : f32 to vector<1x8x128xf32>
    %95 = arith.select %93, %91, %94 : vector<1x8x128xi1>, vector<1x8x128xf32>
    %c0_23 = arith.constant 0 : index
    %c0_24 = arith.constant 0 : index
    %c0_25 = arith.constant 0 : index
    %96 = vector.load %arg5[%c0_23, %c0_24, %c0_25] : memref<1x8x128xf32, #tpu.memory_space<vmem>>, vector<1x8x128xf32>
    tpu.vector_store %arg5[%c0_23, %c0_24, %c0_25], %95 {strides = array<i32>} : memref<1x8x128xf32, #tpu.memory_space<vmem>>, vector<1x8x128xf32>,
    return
  }
  func.func @transform_0(%arg0: i32, %arg1: i32) -> (i32, i32) {
    %c0_i32 = arith.constant 0 : i32
    %c0_i32_0 = arith.constant 0 : i32
    %c0_i32_1 = arith.constant 0 : i32
    return %c0_i32, %c0_i32_0 : i32, i32
  }
  func.func @transform_1(%arg0: i32, %arg1: i32) -> (i32, i32) {
    %c0_i32 = arith.constant 0 : i32
    return %arg0, %arg1 : i32, i32
  }
  func.func @transform_2(%arg0: i32, %arg1: i32) -> (i32, i32) {
    %c0_i32 = arith.constant 0 : i32
    return %arg0, %arg1 : i32, i32
  }
  func.func @transform_3(%arg0: i32, %arg1: i32) -> (i32, i32, i32) {
    %c1_i32 = arith.constant 1 : i32
    %0 = arith.muli %arg0, %c1_i32 : i32
    %1 = arith.addi %0, %arg1 : i32
    %c0_i32 = arith.constant 0 : i32
    %c0_i32_0 = arith.constant 0 : i32
    %c0_i32_1 = arith.constant 0 : i32
    return %1, %c0_i32, %c0_i32_0 : i32, i32, i32
  }
}

</mosaic_0001>

<bundles_post_ra>
// kernel: tpu_custom_call.1
= control target key start
LH: loop header
LB: loop body
LE: loop exit
PB: predicated region body
PF: predicated region fallthrough
CT: control target
= control target key end

     0   :  { %8 = vsyncpa [#allocation5], 0  ;;  %s453_s0 = inlined_call_operand.hbm [shape: f32[1,256], index: 0, kind: input, shape index: {}]   ;;  %s454_s1 = inlined_call_operand.hbm [shape: f32[8,256], index: 1, kind: input, shape index: {}]   ;;  %s455_s2 = inlined_call_operand.hbm [shape: f32[8,256], index: 2, kind: input, shape index: {}]   ;;  %s456_s3 = inlined_call_operand.hbm [shape: f32[1,8,128], index: 3, kind: output, shape index: {}]  }
   0x1   :  { %9 = vsyncpa [#allocation8], 0 }
   0x2   :  { %10 = vsyncpa [#allocation6], 0  ;;  %s342_s12 = smov [#allocation7]   ;;  %s343_s14 = smov [#allocation4]  }
   0x3   :  { %s27_s13 = sshll.u32 %s342_s12, 4  ;;  %s17_s15 = sshll.u32 %s343_s14, 4  ;;  %s28_s13 = int_to_ptr.vmem [resolvable:$true] %s27_s13  ;;  %s18_s15 = int_to_ptr.vmem [resolvable:$true] %s17_s15 }
   0x4   :  { %s248_s18 = scalar_lea.hbm %s454_s1, 256 }
   0x5   :  { %p249_p0 = scmp.ne.s32.totalorder %s454_s1, %s248_s18  ;;  %p252_p1 = scmp.lt.u32.totalorder %s248_s18, %s454_s1 }
   0x7   :  { %p254_p2 = pnand %p252_p1, %p249_p0 }
   0x9   :  { %257 = shalt.err (!%p254_p2)
}
   0xa   :  { %s258_s23 = scalar_lea.vmem %s28_s13, 256  ;;  %p263_p4 = scmp.lt.s32.totalorder %s28_s13, %s28_s13 }
   0xb   :  { %p259_p3 = scmp.ne.s32.totalorder %s28_s13, %s258_s23  ;;  %p264_p5 = scmp.lt.s32.totalorder %s258_s23, %s258_s23 }
   0xd   :  { %p265_p6 = por %p264_p5, %p263_p4 }
   0xf   :  { %p266_p7 = pnand %p265_p6, %p259_p3 }
  0x11   :  { %269 = shalt.err (!%p266_p7)
}
  0x12   :  { %30 = dma.hbm_to_vmem [thread:$0]  %s454_s1, 256, %s28_s13, [#allocation8]  }
  0x13   :  { %s270_s28 = scalar_lea.hbm %s453_s0, 32 }
  0x14   :  { %p271_p8 = scmp.ne.s32.totalorder %s453_s0, %s270_s28  ;;  %p274_p9 = scmp.lt.u32.totalorder %s270_s28, %s453_s0 }
  0x16   :  { %p276_p10 = pnand %p274_p9, %p271_p8 }
  0x18   :  { %279 = shalt.err (!%p276_p10)
}
  0x19   :  { %s280_s6 = scalar_lea.vmem %s18_s15, 32  ;;  %p285_p12 = scmp.lt.s32.totalorder %s18_s15, %s18_s15 }
  0x1a   :  { %p281_p11 = scmp.ne.s32.totalorder %s18_s15, %s280_s6  ;;  %p286_p13 = scmp.lt.s32.totalorder %s280_s6, %s280_s6 }
  0x1c   :  { %p287_p0 = por %p286_p13, %p285_p12 }
  0x1e   :  { %p288_p1 = pnand %p287_p0, %p281_p11 }
  0x20   :  { %291 = shalt.err (!%p288_p1)
}
  0x21   :  { %20 = dma.hbm_to_vmem [thread:$0]  %s453_s0, 32, %s18_s15, [#allocation5]  }
  0x22   :  { %s344_s8 = smov [#allocation9]   ;;  %s292_s12 = scalar_lea.hbm %s455_s2, 256 }
  0x23   :  { %s37_s9 = sshll.u32 %s344_s8, 4  ;;  %p293_p2 = scmp.ne.s32.totalorder %s455_s2, %s292_s12  ;;  %s38_s9 = int_to_ptr.vmem [resolvable:$true] %s37_s9 }
  0x24   :  { %p296_p3 = scmp.lt.u32.totalorder %s292_s12, %s455_s2 }
  0x26   :  { %p298_p4 = pnand %p296_p3, %p293_p2 }
  0x28   :  { %301 = shalt.err (!%p298_p4)
}
  0x29   :  { %s302_s18 = scalar_lea.vmem %s38_s9, 256  ;;  %p307_p6 = scmp.lt.s32.totalorder %s38_s9, %s38_s9 }
  0x2a   :  { %p303_p5 = scmp.ne.s32.totalorder %s38_s9, %s302_s18  ;;  %p308_p7 = scmp.lt.s32.totalorder %s302_s18, %s302_s18 }
  0x2c   :  { %p309_p8 = por %p308_p7, %p307_p6 }
  0x2e   :  { %p310_p9 = pnand %p309_p8, %p303_p5 }
  0x30   :  { %313 = shalt.err (!%p310_p9)
}
  0x31   :  { %40 = dma.hbm_to_vmem [thread:$0]  %s455_s2, 256, %s38_s9, [#allocation8]  }
  0x32   :  { %336 = dma.done.wait [#allocation5], 32  }
  0x33   :  { %337 = vsyncadd [#allocation5], 4294967264 }
  0x34   :  { %338 = dma.done.wait [#allocation8], 512  }
  0x35   :  { %339 = vsyncadd [#allocation8], 4294966784  ;;  %v51_v0 = vld [vmem:[#allocation7] sm:$0xff]  ;;  %v53_v1 = vld [vmem:[#allocation9] sm:$0xff]  ;;  %s345_s19 = smov 112   ;;  %s346_s20 = smov 127   ;;  %v57_v18 = vlaneseq }
  0x36   :  { %v52_v2 = vld [vmem:[#allocation7 + $0x8] sm:$0xff]  ;;  %v55_v3 = vsub.f32 %v51_v0, %v53_v1  ;;  %v54_v4 = vld [vmem:[#allocation9 + $0x8] sm:$0xff]  ;;  %vm76_vm0 = vcmp.gt.f32.partialorder %v53_v1, 0.1  ;;  %vm78_vm1 = vcmp.lt.f32.partialorder %v53_v1, 10.0  ;;  %v347_v13 = vmov 0.0  }
  0x37   :  { %v56_v5 = vsub.f32 %v52_v2, %v54_v4  ;;  %vm77_vm2 = vcmp.gt.f32.partialorder %v54_v4, 0.1  ;;  %vm79_vm3 = vcmp.lt.f32.partialorder %v54_v4, 10.0  ;;  %vm407_vm4 = vmand %vm76_vm0, %vm78_vm1  ;;  %v68_v19 = vld [vmem:[#allocation4] sm:$0x3]  ;;  %v423_v20 = vshrl.u32 %v57_v18, 7 }
  0x38   :  { %101 = vrot.lane.b32.xlu1 %v55_v3, %s345_s19  ;;  %94 = vrot.lane.b32.xlu0 %v55_v3, %s346_s20  ;;  %vm411_vm5 = vmand %vm77_vm2, %vm79_vm3  ;;  %v92_v8 = vsel %vm407_vm4, %v55_v3, 0.0  ;;  %v229_v14 = vsel %vm407_vm4, 1.0, %v347_v13  ;;  %vm69_vm6 = vcmp.gt.f32.partialorder %v68_v19, 0.5  ;;  %v425_v21 = vand.u32 127, %v57_v18  ;;  %s350_s23 = smov [#allocation10]  }
  0x39   :  { %v93_v9 = vsel %vm411_vm5, %v56_v5, 0.0  ;;  %v149_v10 = vmul.f32 %v92_v8, %v92_v8  ;;  %v230_v15 = vsel %vm411_vm5, 1.0, %v347_v13  ;;  %v119_v22 = vsub.s32 0, %v423_v20  ;;  %s219_s24 = sshll.u32 %s350_s23, 4  ;;  %s220_s24 = int_to_ptr.vmem [resolvable:$true] %s219_s24 }
  0x3a   :  { %v150_v11 = vmul.f32 %v93_v9, %v93_v9  ;;  %v175_v16 = vadd.f32 %v230_v15, %v229_v14  ;;  %v161_v17 = vadd.f32 %v93_v9, %v92_v8  ;;  %v123_v23 = vsub.s32 1, %v423_v20  ;;  %s314_s26 = scalar_lea.vmem %s220_s24, 128  ;;  %p319_p11 = scmp.lt.s32.totalorder %s220_s24, %s220_s24 }
  0x3b   :  { %v59_v26 = vadd.s32 128, %v425_v21  ;;  %v348_v27 = vmov 0   ;;  %vm105_vm7 = vcmp.lt.s32.totalorder %v425_v21, 112  ;;  %vm98_vm8 = vcmp.lt.s32.totalorder %v425_v21, 127  ;;  %p315_p10 = scmp.ne.s32.totalorder %s220_s24, %s314_s26  ;;  %p320_p12 = scmp.lt.s32.totalorder %s314_s26, %s314_s26 }
  0x3c   :  { %103 = vrot.lane.b32.xlu1 %v56_v5, %s345_s19  ;;  %96 = vrot.lane.b32.xlu0 %v56_v5, %s346_s20  ;;  %v151_v12 = vadd.f32 %v150_v11, %v149_v10  ;;  %v116_v28 = vsel %vm69_vm6, 1, %v348_v27  ;;  %vm349_vm15 = vmmov 1   ;;  %vm201_vm6 = vcmp.eq.s32.totalorder %v425_v21, 2 }
  0x3d   :  { %v120_v29 = vrot.slane %v116_v28, %v119_v22  ;;  %v124_v30 = vrot.slane %v116_v28, %v123_v23  ;;  %vm67_vm9 = vcmp.lt.s32.totalorder %v59_v26, 240  ;;  %p321_p13 = por %p320_p12, %p319_p11 }
  0x3e   :  { %vm111_vm10 = vmand %vm67_vm9, %vm67_vm9 }
  0x3f   :  { %vm125_vm11 = vcmp.eq.s32.totalorder %v120_v29, 1  ;;  %vm126_vm12 = vcmp.eq.s32.totalorder %v124_v30, 1  ;;  %p322_p0 = pnand %p321_p13, %p315_p10 }
  0x5b   :  { %152 = vadd.xlane.f32.xlu0 %v151_v12 }
  0x5f   :  { %176 = vadd.xlane.f32.xlu0 %v175_v16 }
  0x60   :  { %162 = vadd.xlane.f32.xlu1 %v161_v17 }
  0xaa   :  { %v102_v24 = vpop.permute.xlu1 %101  ;;  %v95_v25 = vpop.permute.xlu0 %94 }
  0xae   :  { %v104_v31 = vpop.permute.xlu1 %103  ;;  %v97_v32 = vpop.permute.xlu0 %96 }
  0xaf   :  { %v106_v33 = vsel %vm105_vm7, %v102_v24, %v104_v31  ;;  %v107_v34 = vsel %vm105_vm7, %v104_v31, %v102_v24  ;;  %v99_v35 = vsel %vm98_vm8, %v95_v25, %v97_v32  ;;  %v100_v36 = vsel %vm98_vm8, %v97_v32, %v95_v25 }
  0xb0   :  { %v129_v37 = vsub.f32 %v106_v33, %v55_v3  ;;  %v130_v38 = vsub.f32 %v107_v34, %v56_v5  ;;  %v112_v39 = vsub.f32 %v99_v35, %v55_v3  ;;  %v113_v40 = vsub.f32 %v100_v36, %v56_v5 }
  0xb1   :  { %vm204_vm7 = vcmp.eq.s32.totalorder %v425_v21, 3  ;;  %vm207_vm8 = vcmp.eq.s32.totalorder %v423_v20, 0 }
  0xb2   :  { %v131_v41 = vand.u32 2147483647, %v129_v37  ;;  %v132_v42 = vand.u32 2147483647, %v130_v38  ;;  %v114_v43 = vand.u32 2147483647, %v112_v39 }
  0xb3   :  { %v115_v44 = vand.u32 2147483647, %v113_v40 }
  0xb4   :  { %v138_v45 = vsel %vm111_vm10, %v132_v42, 0.0  ;;  %v127_v46 = vsel %vm125_vm11, %v114_v43, 0.0 }
  0xb5   :  { %v128_v47 = vsel %vm126_vm12, %v115_v44, 0.0  ;;  %v139_v48 = vadd.f32 %v131_v41, %v127_v46 }
  0xb6   :  { %v140_v49 = vadd.f32 %v138_v45, %v128_v47 }
  0xb7   :  { %vm141_vm13 = vweird.f32 %v139_v48 }
  0xb8   :  { %vm142_vm14 = vweird.f32 %v140_v49  ;;  %vm143_vm0 = vmxor %vm141_vm13, %vm349_vm15 }
  0xb9   :  { %vm144_vm1 = vmxor %vm142_vm14, %vm349_vm15 }
  0xba   :  { %vm145_vm2 = vmand %vm407_vm4, %vm143_vm0  ;;  %vm195_vm4 = vcmp.eq.s32.totalorder %v425_v21, 0 }
  0xbb   :  { %vm146_vm3 = vmand %vm411_vm5, %vm144_vm1  ;;  %v147_v50 = vsel %vm145_vm2, %v139_v48, 0.0  ;;  %vm198_vm5 = vcmp.eq.s32.totalorder %v425_v21, 1 }
  0xbc   :  { %v148_v51 = vsel %vm146_vm3, %v140_v49, 0.0 }
  0xbd   :  { %v185_v52 = vadd.f32 %v148_v51, %v147_v50 }
  0xbf   :  { %186 = vadd.xlane.f32.xlu0 %v185_v52 }
  0xe8   :  { %v153_v53 = vpop.xlane.xlu0 %152 }
  0xe9   :  { %v154_v54 = vrot.slane %v153_v53, 4 }
  0xeb   :  { %v155_v55 = vadd.f32 %v154_v54, %v153_v53 }
  0xec   :  { %v177_v56 = vpop.xlane.xlu0 %176 }
  0xed   :  { %v156_v57 = vrot.slane %v155_v55, 2  ;;  %v163_v58 = vpop.xlane.xlu1 %162  ;;  %v178_v59 = vrot.slane %v177_v56, 4 }
  0xee   :  { %v164_v60 = vrot.slane %v163_v58, 4 }
  0xef   :  { %v179_v61 = vadd.f32 %v178_v59, %v177_v56  ;;  %v157_v62 = vadd.f32 %v156_v57, %v155_v55 }
  0xf0   :  { %v165_v63 = vadd.f32 %v164_v60, %v163_v58 }
  0xf1   :  { %v180_v0 = vrot.slane %v179_v61, 2  ;;  %v158_v1 = vrot.slane %v157_v62, 1 }
  0xf2   :  { %v166_v2 = vrot.slane %v165_v63, 2 }
  0xf3   :  { %v159_v3 = vadd.f32 %v158_v1, %v157_v62  ;;  %v181_v4 = vadd.f32 %v180_v0, %v179_v61 }
  0xf4   :  { %v167_v5 = vadd.f32 %v166_v2, %v165_v63 }
  0xf5   :  { %231 = vpush %v159_v3  ;;  %v182_v6 = vrot.slane %v181_v4, 1 }
  0xf6   :  { %v168_v7 = vrot.slane %v167_v5, 1 }
  0xf7   :  { %v183_v8 = vadd.f32 %v182_v6, %v181_v4 }
  0xf8   :  { %v169_v9 = vadd.f32 %v168_v7, %v167_v5 }
  0xfa   :  { %233 = vpush %v169_v9 }
  0xfb   :  { %235 = vpush %v183_v8 }
 0x126   :  { %s232_s2 = spop %231 }
 0x127   :  { %v196_v17 = vstv %s232_s2 }
 0x128   :  { %v197_v18 = vsel %vm195_vm4, %v196_v17, 0.0 }
 0x12b   :  { %s234_s21 = spop %233 }
 0x12c   :  { %v199_v19 = vstv %s234_s21  ;;  %s236_s22 = spop %235 }
 0x12d   :  { %v200_v22 = vsel %vm198_vm5, %v199_v19, %v197_v18  ;;  %v202_v23 = vstv %s236_s22 }
 0x12e   :  { %v203_v24 = vsel %vm201_vm6, %v202_v23, %v200_v22 }
 0x14c   :  { %v187_v10 = vpop.xlane.xlu0 %186 }
 0x14d   :  { %v188_v11 = vrot.slane %v187_v10, 4 }
 0x14f   :  { %v189_v12 = vadd.f32 %v188_v11, %v187_v10 }
 0x151   :  { %v190_v13 = vrot.slane %v189_v12, 2 }
 0x153   :  { %v191_v14 = vadd.f32 %v190_v13, %v189_v12 }
 0x155   :  { %v192_v15 = vrot.slane %v191_v14, 1 }
 0x157   :  { %v193_v16 = vadd.f32 %v192_v15, %v191_v14 }
 0x159   :  { %237 = vpush %v193_v16 }
 0x18a   :  { %s238_s25 = spop %237 }
 0x18b   :  { %v205_v25 = vstv %s238_s25 }
 0x18c   :  { %v206_v26 = vsel %vm204_vm7, %v205_v25, %v203_v24 }
 0x18d   :  { %v208_v27 = vsel %vm207_vm8, %v206_v26, 0.0 }
 0x18e   :  { %209 = vst [vmem:[#allocation10] sm:$0xff] %v208_v27 }
 0x18f   :  { %325 = shalt.err (!%p322_p0)
}
 0x190   :  { %s326_s29 = scalar_lea.hbm %s456_s3, 128 }
 0x191   :  { %p327_p1 = scmp.ne.s32.totalorder %s456_s3, %s326_s29  ;;  %p330_p2 = scmp.lt.u32.totalorder %s326_s29, %s456_s3 }
 0x193   :  { %p332_p3 = pnand %p330_p2, %p327_p1 }
 0x195   :  { %335 = shalt.err (!%p332_p3)
}
 0x196   :  { %222 = dma.vmem_to_hbm [thread:$0]  %s220_s24, 128, %s456_s3, [#allocation6]  }
 0x197   :  { %340 = dma.done.wait [#allocation6], 128  }
 0x198   :  { %341 = vsyncadd [#allocation6], 4294967168 }
 0x199   :  { %226 = vsyncpa [#allocation5], 1 }
 0x19a   :  { %227 = vsyncpa [#allocation8], 1 }
 0x19b   :  { %228 = vsyncpa [#allocation6], 1 }

</bundles_post_ra>
